<compile_context>
chip_gen: v7x
topology: tpu7x:2x2x1
jax: 0.10.0
libtpu: 0.0.40
codegen_flags: <defaults>
</compile_context>

<pallas_src>
import math

import jax
import jax.numpy as jnp
import numpy as np
from jax import lax
from jax.experimental import pallas as pl
from jax.experimental.pallas import tpu as pltpu

# ----------------------------- problem sizes ------------------------------
B, S, H = 2, 8, 32          # batch, seq-len, num_hiddens (= key/query/value size)
NUM_HEADS = 4
HEAD_DIM = H // NUM_HEADS
FFN_HIDDEN = 64             # ffn_num_hiddens
EPS = 1e-5                  # nn.LayerNorm default eps


# ------------------------------- the kernel -------------------------------
def encoder_block_kernel(valid_lens_ref,                       # SMEM (B,) int32 (scalar prefetch)
                         x_ref,                                # (1, S, H)
                         wqkv_ref,                             # (NH, H, 3*DH) per-head [q|k|v]
                         wo3_ref,                              # (NH, DH, H)
                         g1_ref, bn1_ref,                      # (1, H) layernorm 1 gamma/beta
                         w1_ref, bf1_ref,                      # (H, F), (1, F)
                         w2_ref, bf2_ref,                      # (F, H), (1, H)
                         g2_ref, bn2_ref,                      # (1, H) layernorm 2 gamma/beta
                         o_ref):                               # (1, S, H)
    b = pl.program_id(0)
    x = x_ref[0]                                   # (S, H)
    valid_len = valid_lens_ref[b]                  # scalar int32

    # ---- fused per-head-blocked QKV projection (one batched MXU op) ----
    x_b = jnp.broadcast_to(x[None], (NUM_HEADS, S, H))
    qkv = jnp.einsum('hsd,hde->hse', x_b, wqkv_ref[...],
                     preferred_element_type=jnp.float32)       # (NH, S, 3*DH)
    q3 = qkv[:, :, 0:HEAD_DIM]                                  # (NH, S, DH)
    k3 = qkv[:, :, HEAD_DIM:2 * HEAD_DIM]
    v3 = qkv[:, :, 2 * HEAD_DIM:3 * HEAD_DIM]

    # ---- scores for all heads at once (no kh.T, no per-head loop) ----
    scale = 1.0 / math.sqrt(HEAD_DIM)
    scores = jnp.einsum('hqd,hkd->hqk', q3, k3,
                        preferred_element_type=jnp.float32) * scale  # (NH, S, S)

    # ---- masked softmax over the stacked (NH, S, S) slab ----
    col_ids = lax.broadcasted_iota(jnp.int32, (NUM_HEADS, S, S), 2)
    scores = jnp.where(col_ids < valid_len, scores, -1e6)       # d2l masked_softmax
    scores = scores - jnp.max(scores, axis=-1, keepdims=True)
    p = jnp.exp(scores)
    p = p * pl.reciprocal(jnp.sum(p, axis=-1, keepdims=True), approx=True)

    # ---- PV and output projection; head-concat folded into batched matmul ----
    out3 = jnp.einsum('hqk,hkd->hqd', p, v3,
                      preferred_element_type=jnp.float32)       # (NH, S, DH)
    attn = jnp.einsum('hqd,hdo->hqo', out3, wo3_ref[...],
                      preferred_element_type=jnp.float32)       # (NH, S, H)
    attn_out = jnp.sum(attn, axis=0)                            # (S, H)

    # ---- AddNorm 1: LayerNorm(dropout(Y) + X), dropout == identity ----
    y = attn_out + x
    mu = jnp.mean(y, axis=-1, keepdims=True)
    var = jnp.mean((y - mu) ** 2, axis=-1, keepdims=True)
    y = (y - mu) * lax.rsqrt(var + EPS) * g1_ref[0] + bn1_ref[0]

    # ---- PositionWiseFFN: dense2(relu(dense1(Y))) ----
    hid = jnp.maximum(
        jnp.dot(y, w1_ref[...], preferred_element_type=jnp.float32) + bf1_ref[0], 0.0)
    f = jnp.dot(hid, w2_ref[...], preferred_element_type=jnp.float32) + bf2_ref[0]

    # ---- AddNorm 2 ----
    z = f + y
    mu2 = jnp.mean(z, axis=-1, keepdims=True)
    var2 = jnp.mean((z - mu2) ** 2, axis=-1, keepdims=True)
    o_ref[0] = (z - mu2) * lax.rsqrt(var2 + EPS) * g2_ref[0] + bn2_ref[0]


# ------------------------------ host wrapper -------------------------------
def encoder_block(x, valid_lens, params):
    (wq, wk, wv, wo, g1, bn1, w1, bf1, w2, bf2, g2, bn2) = params

    # Per-head-blocked weight views (built once, outside the kernel).
    def per_head(w):                      # (H, H) -> (NH, H, DH)
        return w.reshape(H, NUM_HEADS, HEAD_DIM).transpose(1, 0, 2)

    wqkv3 = jnp.concatenate([per_head(wq), per_head(wk), per_head(wv)],
                            axis=-1)      # (NH, H, 3*DH)
    wo3 = wo.reshape(NUM_HEADS, HEAD_DIM, H)   # (NH, DH, H)

    def full(shape):
        # whole-array block (block dims == array dims), same tile every grid step
        return pl.BlockSpec(shape, lambda b, vl, _s=shape: tuple(0 for _ in _s))

    in_specs = [
        pl.BlockSpec((1, S, H), lambda b, vl: (b, 0, 0)),      # x
        full((NUM_HEADS, H, 3 * HEAD_DIM)),                    # fused QKV weight
        full((NUM_HEADS, HEAD_DIM, H)),                        # Wo (per-head rows)
        full((1, H)), full((1, H)),                            # ln1 gamma/beta
        full((H, FFN_HIDDEN)), full((1, FFN_HIDDEN)),          # W1, b1
        full((FFN_HIDDEN, H)), full((1, H)),                   # W2, b2
        full((1, H)), full((1, H)),                            # ln2 gamma/beta
    ]
    grid_spec = pltpu.PrefetchScalarGridSpec(
        num_scalar_prefetch=1,
        grid=(B,),
        in_specs=in_specs,
        out_specs=pl.BlockSpec((1, S, H), lambda b, vl: (b, 0, 0)),
    )
    return pl.pallas_call(
        encoder_block_kernel,
        out_shape=jax.ShapeDtypeStruct((B, S, H), jnp.float32),
        grid_spec=grid_spec,
        compiler_params=pltpu.CompilerParams(dimension_semantics=("parallel",)),
    )(valid_lens, x, wqkv3, wo3, g1, bn1, w1, bf1, w2, bf2, g2, bn2)


# --------------------------- pure-JAX reference ----------------------------
def encoder_block_ref(x, valid_lens, params):
    (wq, wk, wv, wo, g1, bn1, w1, bf1, w2, bf2, g2, bn2) = params
    q, k, v = x @ wq, x @ wk, x @ wv                     # (B, S, H)

    def split(t):  # (B, S, H) -> (B, nh, S, dh)
        return t.reshape(B, S, NUM_HEADS, HEAD_DIM).transpose(0, 2, 1, 3)

    qh, kh, vh = split(q), split(k), split(v)
    scores = jnp.einsum('bhqd,bhkd->bhqk', qh, kh) / math.sqrt(HEAD_DIM)
    mask = (jnp.arange(S)[None, None, None, :] <
            valid_lens[:, None, None, None])
    scores = jnp.where(mask, scores, -1e6)
    p = jax.nn.softmax(scores, axis=-1)
    out = jnp.einsum('bhqk,bhkd->bhqd', p, vh).transpose(0, 2, 1, 3).reshape(B, S, H)
    attn = out @ wo

    def layernorm(t, g, bta):
        mu = jnp.mean(t, axis=-1, keepdims=True)
        var = jnp.mean((t - mu) ** 2, axis=-1, keepdims=True)
        return (t - mu) / jnp.sqrt(var + EPS) * g[0] + bta[0]

    y = layernorm(attn + x, g1, bn1)
    f = jnp.maximum(y @ w1 + bf1[0], 0.0) @ w2 + bf2[0]
    return layernorm(f + y, g2, bn2)


# ----------------------------------- main -----------------------------------
if __name__ == "__main__":
    key = jax.random.PRNGKey(0)
    ks = jax.random.split(key, 9)

    x = jax.random.normal(ks[0], (B, S, H), dtype=jnp.float32)
    valid_lens = jnp.array([3, 6], dtype=jnp.int32)           # per-batch valid key length

    def init(k, shape, scale=0.1):
        return scale * jax.random.normal(k, shape, dtype=jnp.float32)

    params = (
        init(ks[1], (H, H)),                 # W_q  (in, out)
        init(ks[2], (H, H)),                 # W_k
        init(ks[3], (H, H)),                 # W_v
        init(ks[4], (H, H)),                 # W_o
        jnp.ones((1, H), jnp.float32),       # ln1 gamma
        jnp.zeros((1, H), jnp.float32),      # ln1 beta
        init(ks[5], (H, FFN_HIDDEN)),        # ffn dense1 weight
        init(ks[6], (1, FFN_HIDDEN)),        # ffn dense1 bias
        init(ks[7], (FFN_HIDDEN, H)),        # ffn dense2 weight
        init(ks[8], (1, H)),                 # ffn dense2 bias
        jnp.ones((1, H), jnp.float32),       # ln2 gamma
        jnp.zeros((1, H), jnp.float32),      # ln2 beta
    )

    out = encoder_block(x, valid_lens, params)
    out = jax.block_until_ready(out)

    ref = encoder_block_ref(x, valid_lens, params)
    # Slightly looser tolerance: softmax denominator uses the EUP approximate
    # reciprocal (pl.reciprocal(..., approx=True)).
    np.testing.assert_allclose(np.asarray(out), np.asarray(ref), rtol=2e-3, atol=2e-3)

    print("KERNEL_OK")
</pallas_src>

<mosaic_0001>
module attributes {stable_mosaic.version = 11 : i64} {
  func.func @encoder_block_kernel(%arg0: i32, %arg1: memref<2xi32, #tpu.memory_space<smem>>, %arg2: memref<1x8x32xf32, #tpu.memory_space<vmem>>, %arg3: memref<4x32x24xf32, #tpu.memory_space<vmem>>, %arg4: memref<4x8x32xf32, #tpu.memory_space<vmem>>, %arg5: memref<1x32xf32, #tpu.memory_space<vmem>>, %arg6: memref<1x32xf32, #tpu.memory_space<vmem>>, %arg7: memref<32x64xf32, #tpu.memory_space<vmem>>, %arg8: memref<1x64xf32, #tpu.memory_space<vmem>>, %arg9: memref<64x32xf32, #tpu.memory_space<vmem>>, %arg10: memref<1x32xf32, #tpu.memory_space<vmem>>, %arg11: memref<1x32xf32, #tpu.memory_space<vmem>>, %arg12: memref<1x32xf32, #tpu.memory_space<vmem>>, %arg13: memref<1x8x32xf32, #tpu.memory_space<vmem>>) attributes {dimension_semantics = [#tpu.dimension_semantics<parallel>], iteration_bounds = array<i64: 2>, scalar_prefetch = 1 : i64, scratch_operands = 0 : i64, tpu.core_type = #tpu.core_type<tc>, window_params = [{transform_indices = @transform_0, window_bounds = array<i64: 1, 8, 32>}, {pipeline_mode = #tpu.pipeline_mode<synchronous>, transform_indices = @transform_1, window_bounds = array<i64: 4, 32, 24>}, {pipeline_mode = #tpu.pipeline_mode<synchronous>, transform_indices = @transform_2, window_bounds = array<i64: 4, 8, 32>}, {pipeline_mode = #tpu.pipeline_mode<synchronous>, transform_indices = @transform_3, window_bounds = array<i64: 1, 32>}, {pipeline_mode = #tpu.pipeline_mode<synchronous>, transform_indices = @transform_4, window_bounds = array<i64: 1, 32>}, {pipeline_mode = #tpu.pipeline_mode<synchronous>, transform_indices = @transform_5, window_bounds = array<i64: 32, 64>}, {pipeline_mode = #tpu.pipeline_mode<synchronous>, transform_indices = @transform_6, window_bounds = array<i64: 1, 64>}, {pipeline_mode = #tpu.pipeline_mode<synchronous>, transform_indices = @transform_7, window_bounds = array<i64: 64, 32>}, {pipeline_mode = #tpu.pipeline_mode<synchronous>, transform_indices = @transform_8, window_bounds = array<i64: 1, 32>}, {pipeline_mode = #tpu.pipeline_mode<synchronous>, transform_indices = @transform_9, window_bounds = array<i64: 1, 32>}, {pipeline_mode = #tpu.pipeline_mode<synchronous>, transform_indices = @transform_10, window_bounds = array<i64: 1, 32>}, {transform_indices = @transform_11, window_bounds = array<i64: 1, 8, 32>}]} {
    %c0 = arith.constant 0 : index
    %c0_0 = arith.constant 0 : index
    %c0_1 = arith.constant 0 : index
    %0 = vector.load %arg2[%c0, %c0_0, %c0_1] : memref<1x8x32xf32, #tpu.memory_space<vmem>>, vector<1x8x32xf32>
    %1 = vector.shape_cast %0 : vector<1x8x32xf32> to vector<8x32xf32>
    %2 = arith.index_cast %arg0 : i32 to index
    %3 = memref.load %arg1[%2] : memref<2xi32, #tpu.memory_space<smem>>
    %4 = vector.shape_cast %1 : vector<8x32xf32> to vector<1x8x32xf32>
    %5 = vector.shape_cast %4 : vector<1x8x32xf32> to vector<1x8x32xf32>
    %6 = vector.broadcast %5 : vector<1x8x32xf32> to vector<4x8x32xf32>
    %c0_2 = arith.constant 0 : index
    %c0_3 = arith.constant 0 : index
    %c0_4 = arith.constant 0 : index
    %7 = vector.load %arg3[%c0_2, %c0_3, %c0_4] : memref<4x32x24xf32, #tpu.memory_space<vmem>>, vector<4x32x24xf32>
    "tpu.trace_start"() <{level = 10 : i32, message = "hsd,hde->hse"}> : () -> ()
    %cst = arith.constant dense<0.000000e+00> : vector<4x8x24xf32>
    %8 = tpu.matmul %6, %7, %cst {dimension_numbers = #tpu.dot_dimension_numbers<[2], [1], [1], [2], [0, 0, 0, 1, 1, 2], [0], [0]>} : vector<4x8x32xf32>, vector<4x32x24xf32>, vector<4x8x24xf32> -> vector<4x8x24xf32>
    "tpu.trace_stop"() : () -> ()
    %9 = vector.extract_strided_slice %8 {offsets = [0, 0, 0], sizes = [4, 8, 8], strides = [1, 1, 1]} : vector<4x8x24xf32> to vector<4x8x8xf32>
    %10 = vector.extract_strided_slice %8 {offsets = [0, 0, 8], sizes = [4, 8, 8], strides = [1, 1, 1]} : vector<4x8x24xf32> to vector<4x8x8xf32>
    %11 = vector.extract_strided_slice %8 {offsets = [0, 0, 16], sizes = [4, 8, 8], strides = [1, 1, 1]} : vector<4x8x24xf32> to vector<4x8x8xf32>
    "tpu.trace_start"() <{level = 10 : i32, message = "hqd,hkd->hqk"}> : () -> ()
    %cst_5 = arith.constant dense<0.000000e+00> : vector<4x8x8xf32>
    %12 = tpu.matmul %9, %10, %cst_5 {dimension_numbers = #tpu.dot_dimension_numbers<[2], [2], [1], [1], [0, 0, 0, 1, 1, 1], [0], [0]>} : vector<4x8x8xf32>, vector<4x8x8xf32>, vector<4x8x8xf32> -> vector<4x8x8xf32>
    "tpu.trace_stop"() : () -> ()
    %cst_6 = arith.constant 0.353553385 : f32
    %13 = vector.broadcast %cst_6 : f32 to vector<4x8x8xf32>
    %14 = arith.mulf %12, %13 : vector<4x8x8xf32>
    %15 = tpu.iota {dimensions = array<i32: 2>} : vector<4x8x8xi32>
    %16 = vector.broadcast %3 : i32 to vector<4x8x8xi32>
    %17 = arith.cmpi slt, %15, %16 : vector<4x8x8xi32>
    %cst_7 = arith.constant -1.000000e+06 : f32
    %18 = vector.broadcast %cst_7 : f32 to vector<4x8x8xf32>
    %19 = arith.select %17, %14, %18 : vector<4x8x8xi1>, vector<4x8x8xf32>
    %cst_8 = arith.constant dense<0xFF800000> : vector<4x8xf32>
    %20 = vector.multi_reduction <maximumf>, %19, %cst_8 [2] : vector<4x8x8xf32> to vector<4x8xf32>
    %21 = vector.shape_cast %20 : vector<4x8xf32> to vector<4x8x1xf32>
    %22 = vector.broadcast %21 : vector<4x8x1xf32> to vector<4x8x8xf32>
    %23 = arith.subf %19, %22 : vector<4x8x8xf32>
    %24 = math.exp %23 : vector<4x8x8xf32>
    %cst_9 = arith.constant dense<0.000000e+00> : vector<4x8xf32>
    %25 = vector.multi_reduction <add>, %24, %cst_9 [2] : vector<4x8x8xf32> to vector<4x8xf32>
    %26 = vector.shape_cast %25 : vector<4x8xf32> to vector<4x8x1xf32>
    %27 = tpu.reciprocal %26 {approx = true} : vector<4x8x1xf32> -> vector<4x8x1xf32>
    %28 = vector.broadcast %27 : vector<4x8x1xf32> to vector<4x8x8xf32>
    %29 = arith.mulf %24, %28 : vector<4x8x8xf32>
    "tpu.trace_start"() <{level = 10 : i32, message = "hqk,hkd->hqd"}> : () -> ()
    %cst_10 = arith.constant dense<0.000000e+00> : vector<4x8x8xf32>
    %30 = tpu.matmul %29, %11, %cst_10 {dimension_numbers = #tpu.dot_dimension_numbers<[2], [1], [1], [2], [0, 0, 0, 1, 1, 2], [0], [0]>} : vector<4x8x8xf32>, vector<4x8x8xf32>, vector<4x8x8xf32> -> vector<4x8x8xf32>
    "tpu.trace_stop"() : () -> ()
    %c0_11 = arith.constant 0 : index
    %c0_12 = arith.constant 0 : index
    %c0_13 = arith.constant 0 : index
    %31 = vector.load %arg4[%c0_11, %c0_12, %c0_13] : memref<4x8x32xf32, #tpu.memory_space<vmem>>, vector<4x8x32xf32>
    "tpu.trace_start"() <{level = 10 : i32, message = "hqd,hdo->hqo"}> : () -> ()
    %cst_14 = arith.constant dense<0.000000e+00> : vector<4x8x32xf32>
    %32 = tpu.matmul %30, %31, %cst_14 {dimension_numbers = #tpu.dot_dimension_numbers<[2], [1], [1], [2], [0, 0, 0, 1, 1, 2], [0], [0]>} : vector<4x8x8xf32>, vector<4x8x32xf32>, vector<4x8x32xf32> -> vector<4x8x32xf32>
    "tpu.trace_stop"() : () -> ()
    %cst_15 = arith.constant dense<0.000000e+00> : vector<8x32xf32>
    %33 = vector.multi_reduction <add>, %32, %cst_15 [0] : vector<4x8x32xf32> to vector<8x32xf32>
    %34 = arith.addf %33, %1 : vector<8x32xf32>
    %cst_16 = arith.constant dense<0.000000e+00> : vector<8xf32>
    %35 = vector.multi_reduction <add>, %34, %cst_16 [1] : vector<8x32xf32> to vector<8xf32>
    %36 = vector.shape_cast %35 : vector<8xf32> to vector<8x1xf32>
    %cst_17 = arith.constant 3.200000e+01 : f32
    %37 = vector.broadcast %cst_17 : f32 to vector<8x1xf32>
    %38 = arith.divf %36, %37 : vector<8x1xf32>
    %39 = vector.broadcast %38 : vector<8x1xf32> to vector<8x32xf32>
    %40 = arith.subf %34, %39 : vector<8x32xf32>
    %41 = arith.mulf %40, %40 : vector<8x32xf32>
    %cst_18 = arith.constant dense<0.000000e+00> : vector<8xf32>
    %42 = vector.multi_reduction <add>, %41, %cst_18 [1] : vector<8x32xf32> to vector<8xf32>
    %43 = vector.shape_cast %42 : vector<8xf32> to vector<8x1xf32>
    %cst_19 = arith.constant 3.200000e+01 : f32
    %44 = vector.broadcast %cst_19 : f32 to vector<8x1xf32>
    %45 = arith.divf %43, %44 : vector<8x1xf32>
    %46 = vector.broadcast %38 : vector<8x1xf32> to vector<8x32xf32>
    %47 = arith.subf %34, %46 : vector<8x32xf32>
    %cst_20 = arith.constant 9.99999974E-6 : f32
    %48 = vector.broadcast %cst_20 : f32 to vector<8x1xf32>
    %49 = arith.addf %45, %48 : vector<8x1xf32>
    %50 = math.rsqrt %49 : vector<8x1xf32>
    %51 = vector.broadcast %50 : vector<8x1xf32> to vector<8x32xf32>
    %52 = arith.mulf %47, %51 : vector<8x32xf32>
    %c0_21 = arith.constant 0 : index
    %c0_22 = arith.constant 0 : index
    %53 = vector.load %arg5[%c0_21, %c0_22] : memref<1x32xf32, #tpu.memory_space<vmem>>, vector<1x32xf32>
    %54 = vector.shape_cast %53 : vector<1x32xf32> to vector<32xf32>
    %55 = vector.shape_cast %54 : vector<32xf32> to vector<1x32xf32>
    %56 = vector.broadcast %55 : vector<1x32xf32> to vector<8x32xf32>
    %57 = arith.mulf %52, %56 : vector<8x32xf32>
    %c0_23 = arith.constant 0 : index
    %c0_24 = arith.constant 0 : index
    %58 = vector.load %arg6[%c0_23, %c0_24] : memref<1x32xf32, #tpu.memory_space<vmem>>, vector<1x32xf32>
    %59 = vector.shape_cast %58 : vector<1x32xf32> to vector<32xf32>
    %60 = vector.shape_cast %59 : vector<32xf32> to vector<1x32xf32>
    %61 = vector.broadcast %60 : vector<1x32xf32> to vector<8x32xf32>
    %62 = arith.addf %57, %61 : vector<8x32xf32>
    %c0_25 = arith.constant 0 : index
    %c0_26 = arith.constant 0 : index
    %63 = vector.load %arg7[%c0_25, %c0_26] : memref<32x64xf32, #tpu.memory_space<vmem>>, vector<32x64xf32>
    %cst_27 = arith.constant dense<0.000000e+00> : vector<8x64xf32>
    %64 = tpu.matmul %62, %63, %cst_27 {dimension_numbers = #tpu.dot_dimension_numbers<[1], [0], [0], [1], [0, 0, 1, 1], [], []>} : vector<8x32xf32>, vector<32x64xf32>, vector<8x64xf32> -> vector<8x64xf32>
    %c0_28 = arith.constant 0 : index
    %c0_29 = arith.constant 0 : index
    %65 = vector.load %arg8[%c0_28, %c0_29] : memref<1x64xf32, #tpu.memory_space<vmem>>, vector<1x64xf32>
    %66 = vector.shape_cast %65 : vector<1x64xf32> to vector<64xf32>
    %67 = vector.shape_cast %66 : vector<64xf32> to vector<1x64xf32>
    %68 = vector.broadcast %67 : vector<1x64xf32> to vector<8x64xf32>
    %69 = arith.addf %64, %68 : vector<8x64xf32>
    %cst_30 = arith.constant 0.000000e+00 : f32
    %70 = vector.broadcast %cst_30 : f32 to vector<8x64xf32>
    %71 = arith.maximumf %69, %70 : vector<8x64xf32>
    %c0_31 = arith.constant 0 : index
    %c0_32 = arith.constant 0 : index
    %72 = vector.load %arg9[%c0_31, %c0_32] : memref<64x32xf32, #tpu.memory_space<vmem>>, vector<64x32xf32>
    %cst_33 = arith.constant dense<0.000000e+00> : vector<8x32xf32>
    %73 = tpu.matmul %71, %72, %cst_33 {dimension_numbers = #tpu.dot_dimension_numbers<[1], [0], [0], [1], [0, 0, 1, 1], [], []>} : vector<8x64xf32>, vector<64x32xf32>, vector<8x32xf32> -> vector<8x32xf32>
    %c0_34 = arith.constant 0 : index
    %c0_35 = arith.constant 0 : index
    %74 = vector.load %arg10[%c0_34, %c0_35] : memref<1x32xf32, #tpu.memory_space<vmem>>, vector<1x32xf32>
    %75 = vector.shape_cast %74 : vector<1x32xf32> to vector<32xf32>
    %76 = vector.shape_cast %75 : vector<32xf32> to vector<1x32xf32>
    %77 = vector.broadcast %76 : vector<1x32xf32> to vector<8x32xf32>
    %78 = arith.addf %73, %77 : vector<8x32xf32>
    %79 = arith.addf %78, %62 : vector<8x32xf32>
    %cst_36 = arith.constant dense<0.000000e+00> : vector<8xf32>
    %80 = vector.multi_reduction <add>, %79, %cst_36 [1] : vector<8x32xf32> to vector<8xf32>
    %81 = vector.shape_cast %80 : vector<8xf32> to vector<8x1xf32>
    %cst_37 = arith.constant 3.200000e+01 : f32
    %82 = vector.broadcast %cst_37 : f32 to vector<8x1xf32>
    %83 = arith.divf %81, %82 : vector<8x1xf32>
    %84 = vector.broadcast %83 : vector<8x1xf32> to vector<8x32xf32>
    %85 = arith.subf %79, %84 : vector<8x32xf32>
    %86 = arith.mulf %85, %85 : vector<8x32xf32>
    %cst_38 = arith.constant dense<0.000000e+00> : vector<8xf32>
    %87 = vector.multi_reduction <add>, %86, %cst_38 [1] : vector<8x32xf32> to vector<8xf32>
    %88 = vector.shape_cast %87 : vector<8xf32> to vector<8x1xf32>
    %cst_39 = arith.constant 3.200000e+01 : f32
    %89 = vector.broadcast %cst_39 : f32 to vector<8x1xf32>
    %90 = arith.divf %88, %89 : vector<8x1xf32>
    %91 = vector.broadcast %83 : vector<8x1xf32> to vector<8x32xf32>
    %92 = arith.subf %79, %91 : vector<8x32xf32>
    %cst_40 = arith.constant 9.99999974E-6 : f32
    %93 = vector.broadcast %cst_40 : f32 to vector<8x1xf32>
    %94 = arith.addf %90, %93 : vector<8x1xf32>
    %95 = math.rsqrt %94 : vector<8x1xf32>
    %96 = vector.broadcast %95 : vector<8x1xf32> to vector<8x32xf32>
    %97 = arith.mulf %92, %96 : vector<8x32xf32>
    %c0_41 = arith.constant 0 : index
    %c0_42 = arith.constant 0 : index
    %98 = vector.load %arg11[%c0_41, %c0_42] : memref<1x32xf32, #tpu.memory_space<vmem>>, vector<1x32xf32>
    %99 = vector.shape_cast %98 : vector<1x32xf32> to vector<32xf32>
    %100 = vector.shape_cast %99 : vector<32xf32> to vector<1x32xf32>
    %101 = vector.broadcast %100 : vector<1x32xf32> to vector<8x32xf32>
    %102 = arith.mulf %97, %101 : vector<8x32xf32>
    %c0_43 = arith.constant 0 : index
    %c0_44 = arith.constant 0 : index
    %103 = vector.load %arg12[%c0_43, %c0_44] : memref<1x32xf32, #tpu.memory_space<vmem>>, vector<1x32xf32>
    %104 = vector.shape_cast %103 : vector<1x32xf32> to vector<32xf32>
    %105 = vector.shape_cast %104 : vector<32xf32> to vector<1x32xf32>
    %106 = vector.broadcast %105 : vector<1x32xf32> to vector<8x32xf32>
    %107 = arith.addf %102, %106 : vector<8x32xf32>
    %c0_45 = arith.constant 0 : index
    %c0_46 = arith.constant 0 : index
    %c0_47 = arith.constant 0 : index
    %108 = vector.load %arg13[%c0_45, %c0_46, %c0_47] : memref<1x8x32xf32, #tpu.memory_space<vmem>>, vector<1x8x32xf32>
    %109 = vector.shape_cast %108 : vector<1x8x32xf32> to vector<8x32xf32>
    %110 = vector.shape_cast %107 : vector<8x32xf32> to vector<1x8x32xf32>
    tpu.vector_store %arg13[%c0_45, %c0_46, %c0_47], %110 {strides = array<i32>} : memref<1x8x32xf32, #tpu.memory_space<vmem>>, vector<1x8x32xf32>,
    return
  }
  func.func @transform_0(%arg0: i32, %arg1: memref<2xi32, #tpu.memory_space<smem>>) -> (i32, i32, i32) {
    %c0_i32 = arith.constant 0 : i32
    %c0_i32_0 = arith.constant 0 : i32
    %c0_i32_1 = arith.constant 0 : i32
    return %arg0, %c0_i32, %c0_i32_0 : i32, i32, i32
  }
  func.func @transform_1(%arg0: i32, %arg1: memref<2xi32, #tpu.memory_space<smem>>) -> (i32, i32, i32) {
    %c0_i32 = arith.constant 0 : i32
    %c0_i32_0 = arith.constant 0 : i32
    %c0_i32_1 = arith.constant 0 : i32
    %c0_i32_2 = arith.constant 0 : i32
    return %c0_i32, %c0_i32_0, %c0_i32_1 : i32, i32, i32
  }
  func.func @transform_2(%arg0: i32, %arg1: memref<2xi32, #tpu.memory_space<smem>>) -> (i32, i32, i32) {
    %c0_i32 = arith.constant 0 : i32
    %c0_i32_0 = arith.constant 0 : i32
    %c0_i32_1 = arith.constant 0 : i32
    %c0_i32_2 = arith.constant 0 : i32
    return %c0_i32, %c0_i32_0, %c0_i32_1 : i32, i32, i32
  }
  func.func @transform_3(%arg0: i32, %arg1: memref<2xi32, #tpu.memory_space<smem>>) -> (i32, i32) {
    %c0_i32 = arith.constant 0 : i32
    %c0_i32_0 = arith.constant 0 : i32
    %c0_i32_1 = arith.constant 0 : i32
    return %c0_i32, %c0_i32_0 : i32, i32
  }
  func.func @transform_4(%arg0: i32, %arg1: memref<2xi32, #tpu.memory_space<smem>>) -> (i32, i32) {
    %c0_i32 = arith.constant 0 : i32
    %c0_i32_0 = arith.constant 0 : i32
    %c0_i32_1 = arith.constant 0 : i32
    return %c0_i32, %c0_i32_0 : i32, i32
  }
  func.func @transform_5(%arg0: i32, %arg1: memref<2xi32, #tpu.memory_space<smem>>) -> (i32, i32) {
    %c0_i32 = arith.constant 0 : i32
    %c0_i32_0 = arith.constant 0 : i32
    %c0_i32_1 = arith.constant 0 : i32
    return %c0_i32, %c0_i32_0 : i32, i32
  }
  func.func @transform_6(%arg0: i32, %arg1: memref<2xi32, #tpu.memory_space<smem>>) -> (i32, i32) {
    %c0_i32 = arith.constant 0 : i32
    %c0_i32_0 = arith.constant 0 : i32
    %c0_i32_1 = arith.constant 0 : i32
    return %c0_i32, %c0_i32_0 : i32, i32
  }
  func.func @transform_7(%arg0: i32, %arg1: memref<2xi32, #tpu.memory_space<smem>>) -> (i32, i32) {
    %c0_i32 = arith.constant 0 : i32
    %c0_i32_0 = arith.constant 0 : i32
    %c0_i32_1 = arith.constant 0 : i32
    return %c0_i32, %c0_i32_0 : i32, i32
  }
  func.func @transform_8(%arg0: i32, %arg1: memref<2xi32, #tpu.memory_space<smem>>) -> (i32, i32) {
    %c0_i32 = arith.constant 0 : i32
    %c0_i32_0 = arith.constant 0 : i32
    %c0_i32_1 = arith.constant 0 : i32
    return %c0_i32, %c0_i32_0 : i32, i32
  }
  func.func @transform_9(%arg0: i32, %arg1: memref<2xi32, #tpu.memory_space<smem>>) -> (i32, i32) {
    %c0_i32 = arith.constant 0 : i32
    %c0_i32_0 = arith.constant 0 : i32
    %c0_i32_1 = arith.constant 0 : i32
    return %c0_i32, %c0_i32_0 : i32, i32
  }
  func.func @transform_10(%arg0: i32, %arg1: memref<2xi32, #tpu.memory_space<smem>>) -> (i32, i32) {
    %c0_i32 = arith.constant 0 : i32
    %c0_i32_0 = arith.constant 0 : i32
    %c0_i32_1 = arith.constant 0 : i32
    return %c0_i32, %c0_i32_0 : i32, i32
  }
  func.func @transform_11(%arg0: i32, %arg1: memref<2xi32, #tpu.memory_space<smem>>) -> (i32, i32, i32) {
    %c0_i32 = arith.constant 0 : i32
    %c0_i32_0 = arith.constant 0 : i32
    %c0_i32_1 = arith.constant 0 : i32
    return %arg0, %c0_i32, %c0_i32_0 : i32, i32, i32
  }
}

</mosaic_0001>

<bundles_post_ra>
// kernel: tpu_custom_call.1
= control target key start
LH: loop header
LB: loop body
LE: loop exit
PB: predicated region body
PF: predicated region fallthrough
CT: control target
= control target key end

     0   :  { %s2820_s0 = inlined_call_operand.vmem [shape: s32[2], index: 0, kind: input, shape index: {}]   ;;  %s2821_s1 = inlined_call_operand.vmem [shape: f32[2,8,32], index: 1, kind: input, shape index: {}]   ;;  %s2822_s2 = inlined_call_operand.vmem [shape: f32[4,32,24], index: 2, kind: input, shape index: {}]   ;;  %s2823_s3 = inlined_call_operand.vmem [shape: f32[4,8,32], index: 3, kind: input, shape index: {}]   ;;  %s2824_s4 = inlined_call_operand.vmem [shape: f32[1,32], index: 4, kind: input, shape index: {}]   ;;  %s2825_s5 = inlined_call_operand.vmem [shape: f32[1,32], index: 5, kind: input, shape index: {}]   ;;  %s2826_s6 = inlined_call_operand.vmem [shape: f32[32,64], index: 6, kind: input, shape index: {}]   ;;  %s2827_s7 = inlined_call_operand.vmem [shape: f32[1,64], index: 7, kind: input, shape index: {}]   ;;  %s2828_s8 = inlined_call_operand.vmem [shape: f32[64,32], index: 8, kind: input, shape index: {}]   ;;  %s2829_s9 = inlined_call_operand.vmem [shape: f32[1,32], index: 9, kind: input, shape index: {}]   ;;  %s2830_s10 = inlined_call_operand.vmem [shape: f32[1,32], index: 10, kind: input, shape index: {}]   ;;  %s2831_s11 = inlined_call_operand.vmem [shape: f32[1,32], index: 11, kind: input, shape index: {}]   ;;  %s2832_s12 = inlined_call_operand.hbm [shape: f32[2,8,32], index: 12, kind: output, shape index: {}]  }
   0x1   :  { %s17_s23 = sshll.u32 %s2820_s0, 4  ;;  %s18_s23 = int_to_ptr.vmem [resolvable:$true] %s17_s23 }
   0x2   :  { %s2309_s24 = scalar_lea.vmem %s18_s23, 16  ;;  %p2314_p1 = scmp.lt.s32.totalorder %s18_s23, %s18_s23 }
   0x3   :  { %p2310_p0 = scmp.ne.s32.totalorder %s18_s23, %s2309_s24  ;;  %p2315_p2 = scmp.lt.s32.totalorder %s2309_s24, %s2309_s24 }
   0x5   :  { %p2316_p3 = por %p2315_p2, %p2314_p1 }
   0x7   :  { %p2317_p4 = pnand %p2316_p3, %p2310_p0 }
   0x9   :  { %2320 = shalt.err (!%p2317_p4)  }
   0xa   :  { %s2387_s25 = smov [#allocation3]  }
   0xb   :  { %20 = dma.vmem_to_smem %s18_s23, 16, %s2387_s25, [#allocation2] }
   0xc   :  { %2365 = dma.done.wait [#allocation2], 16 }
   0xd   :  { %2366 = vsyncadd [#allocation2], 4294967280 }
   0xe   :  { %22 = sfence }
   0xf   :  { %23 = vsyncpa [#allocation5], 0 }
  0x10   :  { %25 = vsyncpa [#allocation5 + $0x1], 0  ;;  %s2462_s26 = smov 0   ;;  %s2464_s27 = smov 0  }
  0x11   :  { %s2466_s0 = smov 0   ;;  %s2468_s28 = smov 0  }
  0x12 LB: > { %2834 = sst [smem:[#allocation8_spill]] %s2381_s0  ;;  %s2483_s29 = sadd.s32 4294967295, %s2385_s28   ;;  %s2385_s28 = sphi %s2468_s28, %s2845_s28   ;;  %s2381_s0 = sphi %s2466_s0, %s2844_s0   ;;  %s2377_s27 = sphi %s2464_s27, %s2843_s27   ;;  %s2373_s26 = sphi %s2462_s26, %s2842_s26  }
  0x13   : > { %s1972_s30 = sadd.s32 4294967294, %s2385_s28   ;;  %s2487_s13 = sadd.s32 1, %s2385_s28  }
  0x14   : > { %s274_s14 = sadd.s32 1, %s2381_s0  ;;  %s271_s15 = ssub.s32 %s2385_s28, %s2487_s13 }
  0x15   : > { %p284_p5 = scmp.ne.s32.totalorder %s2381_s0, %s2377_s27  ;;  %p272_p6 = scmp.eq.s32.totalorder %s271_s15, 0 }
  0x16   : > { %p285_p7 = scmp.eq.s32.totalorder %s2483_s29, 1  ;;  %p290_p8 = scmp.ne.s32.totalorder %s2377_s27, %s2373_s26 }
  0x17   : > { %p291_p9 = scmp.eq.s32.totalorder %s1972_s30, 1  ;;  %p1975_p12 = scmp.ge.s32.totalorder %s2385_s28, 1 }
  0x18   : > { %s2498_s16 = scalar_select %p272_p6, %s2381_s0, %s274_s14  }
  0x19   : > { %p2500_p10 = por %p285_p7, %p284_p5  ;;  %p2504_p11 = por %p291_p9, %p290_p8 }
  0x1a   : > { %2835 = sst [smem:[#allocation9_spill]] %s2498_s16  ;;  %p346_p13 = scmp.lt.s32.totalorder %s2385_s28, 3 }
  0x1c   : > { %p347_p0 = pnand %p1975_p12, %p346_p13 }
  0x1d   : > { %v391_v0 = vld [vmem:[%s2822_s2] sm:$0xff] (!%p347_p0)  ;;  %v392_v1 = vld [vmem:[%s2822_s2 + $0x8] sm:$0xff] (!%p347_p0)  ;;  %v2388_v3 = vmov (!%p347_p0), 0.0|0.0   ;;  %v393_v6 = vld [vmem:[%s2822_s2 + $0x10] sm:$0xff] (!%p347_p0)  ;;  %p385_p1 = scmp.lt.s32.totalorder (!%p347_p0), %s2483_s29, 1  ;;  %vm2389_vm0 = vmmov (!%p347_p0), 0   ;;  %v1004_v39 = vlaneseq (!%p347_p0) }
  0x1e   : > { %350 = sbr.rel (%p347_p0) target bundleno = 2414 (0x96e), region = 64  ;;  %v395_v2 = vld [vmem:[%s2822_s2 + $0x20] sm:$0xff] (!%p347_p0)  ;;  %2202 = vmatprep.subr.bf16.mxu0 (!%p347_p0), %v2388_v3  ;;  %v2203_v4 = vpack.c.bf16 (!%p347_p0), %v392_v1, %v391_v0  ;;  %2208 = vmatprep.subr.bf16.mxu1 (!%p347_p0), %v2388_v3  ;;  %v396_v5 = vld [vmem:[%s2822_s2 + $0x28] sm:$0xff] (!%p347_p0)  ;;  %v394_v7 = vld [vmem:[%s2822_s2 + $0x18] sm:$0xff] (!%p347_p0)  ;;  %v2390_v9 = vmov (!%p347_p0), 0.0   ;;  %vm407_vm1 = vcmask (!%p347_p0), 261120  }
  0x1f   : > { %v2209_v8 = vpack.c.bf16 (!%p347_p0), %v396_v5, %v395_v2  ;;  %2076 = vmatprep.mubr.msk.f32.mxu0 (!%p347_p0), %vm2389_vm0, %v2390_v9  ;;  %v397_v10 = vld [vmem:[%s2822_s2 + $0x30] sm:$0xff] (!%p347_p0)  ;;  %v398_v11 = vld [vmem:[%s2822_s2 + $0x38] sm:$0xff] (!%p347_p0)  ;;  %2087 = vmatprep.mubr.msk.f32.mxu1 (!%p347_p0), %vm2389_vm0, %v2390_v9  ;;  %v2206_v12 = vpack.c.bf16 (!%p347_p0), %v394_v7, %v393_v6  ;;  %v399_v14 = vld [vmem:[%s2822_s2 + $0x40] sm:$0xff] (!%p347_p0)  ;;  %s2391_s22 = smov (!%p347_p0), 120   ;;  %vm694_vm2 = vcmask (!%p347_p0), 64512   ;;  %s390_s23 = sld [smem:[#allocation3 + %s2483_s29]] (!%p347_p0) }
  0x20   : > { %2204 = vmatpush3.bf16.msra.mxu0 (!%p347_p0), %v2203_v4  ;;  %v2212_v13 = vpack.c.bf16 (!%p347_p0), %v398_v11, %v397_v10  ;;  %v400_v15 = vld [vmem:[%s2822_s2 + $0x48] sm:$0xff] (!%p347_p0)  ;;  %v403_v16 = vld [vmem:[%s2822_s2 + $0x60] sm:$0xff] (!%p347_p0)  ;;  %v401_v21 = vld [vmem:[%s2822_s2 + $0x50] sm:$0xff] (!%p347_p0)  ;;  %v1005_v40 = vand.u32 (!%p347_p0), 127, %v1004_v39  ;;  %s2392_s24 = smov (!%p347_p0), 112   ;;  %vm1794_vm4 = vcmask (!%p347_p0), 523264  }
  0x21   : > { %2205 = vmatprep.subr.bf16.mxu0 (!%p347_p0), %v2388_v3  ;;  %2210 = vmatpush3.bf16.msra.mxu1 (!%p347_p0), %v2209_v8  ;;  %v404_v17 = vld [vmem:[%s2822_s2 + $0x68] sm:$0xff] (!%p347_p0)  ;;  %v2215_v19 = vpack.c.bf16 (!%p347_p0), %v400_v15, %v399_v14  ;;  %v402_v22 = vld [vmem:[%s2822_s2 + $0x58] sm:$0xff] (!%p347_p0)  ;;  %v405_v23 = vld [vmem:[%s2822_s2 + $0x70] sm:$0xff] (!%p347_p0)  ;;  %s382_s19 = sand.u32 (!%p347_p0), 1, %s2377_s27  }
  0x22   : > { %2211 = vmatprep.subr.bf16.mxu1 (!%p347_p0), %v2388_v3  ;;  %v2221_v20 = vpack.c.bf16 (!%p347_p0), %v404_v17, %v403_v16  ;;  %v406_v24 = vld [vmem:[%s2822_s2 + $0x78] sm:$0xff] (!%p347_p0)  ;;  %v2218_v25 = vpack.c.bf16 (!%p347_p0), %v402_v22, %v401_v21  ;;  %v1361_v39 = vld [vmem:[%s2823_s3 + $0x8] sm:$0xff] (!%p347_p0)  ;;  %s1976_s0 = sshll.u32 (!%p347_p0), %s382_s19, 3  ;;  %s1900_s16 = scalar_lea.sflag (!%p347_p0), [#allocation5], %s382_s19 }
  0x23   : > { %v2224_v26 = vpack.c.bf16 (!%p347_p0), %v406_v24, %v405_v23  ;;  %v1363_v43 = vld [vmem:[%s2823_s3 + $0x18] sm:$0xff] (!%p347_p0) }
  0x24   : > { %2207 = vmatpush3.bf16.msra.mxu0 (!%p347_p0), %v2206_v12 }
  0x25   : > { %s386_s25 = scalar_select %p385_p1, %s2483_s29, 1  ;;  %2213 = vmatpush3.bf16.msra.mxu1 %v2212_v13  ;;  %2214 = vmatprep.subr.bf16.mxu0 %v2388_v3  ;;  %v1006_v41 = vstv %s390_s23 }
  0x26   : > { %2220 = vmatprep.subr.bf16.mxu1 %v2388_v3  ;;  %vm2632_vm3 = vcmp.lt.s32.totalorder %v1005_v40, %v1006_v41  ;;  %v1362_v40 = vld [vmem:[%s2823_s3 + $0x10] sm:$0xff]  ;;  %s2007_s23 = sshll.u32 %s2483_s29, 7  ;;  %s2393_s29 = smov [#allocation4]  }
  0x27   : > { %s1977_s20 = sshll.u32 %s386_s25, 3  ;;  %s2777_s15 = scalar_lea.hbm %s2832_s12, %s2007_s23 }
  0x28   : > { %s388_s30 = scalar_lea.vmem %s2821_s1, %s1977_s20 }
  0x29   : > { %v2559_v18 = vld [vmem:[%s388_s30] sm:$0xff] }
  0x2a   : > { %2077 = vmatmul.mubr.msk.f32.vlgmr.msra.gmra.mrb[0].mxu0 %vm407_vm1, %v2559_v18  ;;  %2088 = vmatmul.mubr.msk.f32.vlgmr.msra.gmra.mrb[0].mxu1 %vm407_vm1, %v2559_v18 }
  0x2b   : > { %2216 = vmatpush3.bf16.msra.mxu0 %v2215_v19  ;;  %2222 = vmatpush3.bf16.msra.mxu1 %v2221_v20 }
  0x2c   : > { %2217 = vmatprep.subr.bf16.mxu0 %v2388_v3  ;;  %2098 = vmatprep.mubr.msk.f32.mxu0 %vm2389_vm0, %v2390_v9 }
  0x2d   : > { %2223 = vmatprep.subr.bf16.mxu1 %v2388_v3  ;;  %2109 = vmatprep.mubr.msk.f32.mxu1 %vm2389_vm0, %v2390_v9 }
  0x2f   : > { %2219 = vmatpush3.bf16.msra.mxu0 %v2218_v25  ;;  %2225 = vmatpush3.bf16.msra.mxu1 %v2224_v26 }
  0x30   : > { %2112 = vmatprep.subr.mxu0 %v2390_v9  ;;  %2127 = vmatprep.subr.mxu1 %v2390_v9 }
  0x32   : > { %2099 = vmatmul.mubr.msk.f32.vlgmr.msra.gmra.mrb[2].mxu0 %vm407_vm1, %v2559_v18  ;;  %2110 = vmatmul.mubr.msk.f32.vlgmr.msra.gmra.mrb[2].mxu1 %vm407_vm1, %v2559_v18 }
  0x33   : > { %2114 = vmatprep.mubr.msk.f32.mxu0 %vm2389_vm0, %v2390_v9  ;;  %2129 = vmatprep.mubr.msk.f32.mxu1 %vm2389_vm0, %v2390_v9 }
  0xfd   : > { %v2595_v27 = vpop.f32.mrb[0].mxu0  ;;  %v2598_v29 = vpop.f32.mrb[0].mxu1 }
  0xfe   : > { %692 = vrot.lane.b32.xlu0 %v2595_v27, %s2391_s22  ;;  %v2078_v28 = vpop.f32.mrb[1].mxu0  ;;  %v2089_v30 = vpop.f32.mrb[1].mxu1 }
 0x102   : > { %770 = vrot.lane.b32.xlu0 %v2598_v29, %s2391_s22 }
 0x105   : > { %v2601_v31 = vpop.f32.mrb[2].mxu0  ;;  %v2604_v33 = vpop.f32.mrb[2].mxu1 }
 0x106   : > { %847 = vrot.lane.b32.xlu1 %v2601_v31, %s2391_s22  ;;  %v2100_v32 = vpop.f32.mrb[3].mxu0  ;;  %v2111_v34 = vpop.f32.mrb[3].mxu1 }
 0x10a   : > { %924 = vrot.lane.b32.xlu1 %v2604_v33, %s2391_s22 }
 0x170   : > { %v693_v35 = vpop.permute.xlu0 %692 }
 0x171   : > { %2113 = vmatpush3.xpose.msk.msra.mxu0 %vm694_vm2, %v693_v35 }
 0x172   : > { %2117 = vmatprep.subr.mxu0 %v2390_v9 }
 0x174   : > { %2115 = vmatmul.mubr.msk.f32.vlgmr.msra.gmra.mrb[4].mxu0 %vm694_vm2, %v2595_v27  ;;  %v771_v36 = vpop.permute.xlu0 %770 }
 0x175   : > { %2118 = vmatpush3.xpose.msk.msra.mxu0 %vm694_vm2, %v771_v36  ;;  %2119 = vmatprep.mubr.msk.f32.mxu0 %vm2389_vm0, %v2390_v9 }
 0x176   : > { %2122 = vmatprep.subr.mxu0 %v2390_v9 }
 0x178   : > { %2120 = vmatmul.mubr.msk.f32.vlgmr.msra.gmra.mrb[6].mxu0 %vm694_vm2, %v2598_v29  ;;  %v848_v37 = vpop.permute.xlu1 %847 }
 0x179   : > { %2123 = vmatpush3.xpose.msk.msra.mxu0 %vm694_vm2, %v848_v37  ;;  %2124 = vmatprep.mubr.msk.f32.mxu0 %vm2389_vm0, %v2390_v9 }
 0x17a   : > { %2132 = vmatprep.subr.mxu0 %v2390_v9 }
 0x17c   : > { %2125 = vmatmul.mubr.msk.f32.vlgmr.msra.gmra.mrb[8].mxu0 %vm694_vm2, %v2601_v31  ;;  %v925_v38 = vpop.permute.xlu1 %924 }
 0x17d   : > { %2128 = vmatpush3.xpose.msk.msra.mxu1 %vm694_vm2, %v925_v38  ;;  %2134 = vmatprep.mubr.msk.f32.mxu0 %vm2389_vm0, %v2390_v9  ;;  %v1360_v38 = vld [vmem:[%s2823_s3] sm:$0xff] }
 0x17e   : > { %2137 = vmatprep.subr.mxu1 %v2390_v9 }
 0x180   : > { %2130 = vmatmul.mubr.msk.f32.vlgmr.msra.gmra.mrb[4].mxu1 %vm694_vm2, %v2604_v33 }
 0x181   : > { %2139 = vmatprep.mubr.msk.f32.mxu1 %vm2389_vm0, %v2390_v9 }
 0x247   : > { %v765_v42 = vpop.f32.mrb[4].mxu0 }
 0x248   : > { %v1000_v44 = vmul.f32 0.35355338, %v765_v42  ;;  %v2116_v45 = vpop.f32.mrb[5].mxu0 }
 0x24a   : > { %v1008_v46 = vsel %vm2632_vm3, %v1000_v44, -1000000.0 }
 0x24b   : > { %v842_v47 = vpop.f32.mrb[6].mxu0  ;;  %v1012_v48 = vsel %vm694_vm2, %v1008_v46, -inf }
 0x24c   : > { %v1001_v49 = vmul.f32 0.35355338, %v842_v47  ;;  %1013 = vmax.xlane.f32.xlu0 %v1012_v48  ;;  %v2121_v50 = vpop.f32.mrb[7].mxu0 }
 0x24e   : > { %v1009_v51 = vsel %vm2632_vm3, %v1001_v49, -1000000.0 }
 0x24f   : > { %v919_v52 = vpop.f32.mrb[8].mxu0  ;;  %v1015_v53 = vsel %vm694_vm2, %v1009_v51, -inf }
 0x250   : > { %v1002_v54 = vmul.f32 0.35355338, %v919_v52  ;;  %1016 = vmax.xlane.f32.xlu1 %v1015_v53  ;;  %v2126_v55 = vpop.f32.mrb[9].mxu0 }
 0x252   : > { %v1010_v56 = vsel %vm2632_vm3, %v1002_v54, -1000000.0 }
 0x253   : > { %v996_v57 = vpop.f32.mrb[4].mxu1  ;;  %v1018_v58 = vsel %vm694_vm2, %v1010_v56, -inf }
 0x254   : > { %v1003_v59 = vmul.f32 0.35355338, %v996_v57  ;;  %v2131_v60 = vpop.f32.mrb[5].mxu1  ;;  %1019 = vmax.xlane.f32.xlu0 %v1018_v58 }
 0x256   : > { %v1011_v61 = vsel %vm2632_vm3, %v1003_v59, -1000000.0 }
 0x257   : > { %v1021_v62 = vsel %vm694_vm2, %v1011_v61, -inf }
 0x258   : > { %1022 = vmax.xlane.f32.xlu0 %v1021_v62 }
 0x261   : > { %1056 = vrot.lane.b32.xlu1 %v2595_v27, %s2392_s24 }
 0x2d9   : > { %v1014_v63 = vpop.xlane.xlu0 %1013 }
 0x2da   : > { %v1024_v0 = vsub.f32 %v1008_v46, %v1014_v63 }
 0x2dc   : > { %v1028_v1 = vmul.f32 1.442695, %v1024_v0 }
 0x2dd   : > { %v1017_v2 = vpop.xlane.xlu1 %1016 }
 0x2de   : > { %2289 = vpow2.f32 %v1028_v1  ;;  %v1025_v4 = vsub.f32 %v1009_v51, %v1017_v2 }
 0x2e0   : > { %v1030_v5 = vmul.f32 1.442695, %v1025_v4 }
 0x2e1   : > { %v1057_v6 = vpop.permute.xlu1 %1056  ;;  %v1020_v7 = vpop.xlane.xlu0 %1019 }
 0x2e2   : > { %2291 = vpow2.f32 %v1030_v5  ;;  %v1026_v8 = vsub.f32 %v1010_v56, %v1020_v7  ;;  %2133 = vmatpush3.msra.mxu0 %v1057_v6 }
 0x2e3   : > { %2142 = vmatprep.subr.mxu0 %v2390_v9 }
 0x2e4   : > { %v1032_v10 = vmul.f32 1.442695, %v1026_v8  ;;  %v1694_v8 = vld [vmem:[%s2826_s6] sm:$0xff] }
 0x2e5   : > { %v1023_v11 = vpop.xlane.xlu0 %1022 }
 0x2e6   : > { %2293 = vpow2.f32 %v1032_v10  ;;  %v1027_v12 = vsub.f32 %v1011_v61, %v1023_v11  ;;  %v1695_v10 = vld [vmem:[%s2826_s6 + $0x8] sm:$0xff] }
 0x2e7   : > { %v2227_v11 = vpack.c.bf16 %v1695_v10, %v1694_v8 }
 0x2e8   : > { %v2290_v13 = vpop.eup %2289  ;;  %v1034_v14 = vmul.f32 1.442695, %v1027_v12  ;;  %v1697_v12 = vld [vmem:[%s2826_s6 + $0x18] sm:$0xff] }
 0x2e9   : > { %v1036_v15 = vsel %vm694_vm2, %v2290_v13, 0.0 }
 0x2ea   : > { %2295 = vpow2.f32 %v1034_v14  ;;  %1037 = vadd.xlane.f32.xlu1 %v1036_v15  ;;  %v1779_v14 = vld [vmem:[%s2828_s8] sm:$0xff]  ;;  %v1780_v15 = vld [vmem:[%s2828_s8 + $0x8] sm:$0xff] }
 0x2ec   : > { %v2292_v16 = vpop.eup %2291 }
 0x2ed   : > { %v1039_v17 = vsel %vm694_vm2, %v2292_v16, 0.0 }
 0x2ee   : > { %1040 = vadd.xlane.f32.xlu0 %v1039_v17  ;;  %v2233_v17 = vpack.c.bf16 %v1780_v15, %v1779_v14 }
 0x2f0   : > { %v2294_v19 = vpop.eup %2293 }
 0x2f1   : > { %v1042_v20 = vsel %vm694_vm2, %v2294_v19, 0.0 }
 0x2f2   : > { %1043 = vadd.xlane.f32.xlu1 %v1042_v20 }
 0x2f4   : > { %v2296_v21 = vpop.eup %2295 }
 0x2f5   : > { %v1045_v22 = vsel %vm694_vm2, %v2296_v21, 0.0 }
 0x2f6   : > { %1046 = vadd.xlane.f32.xlu0 %v1045_v22  ;;  %v1784_v22 = vld [vmem:[%s2828_s8 + $0x28] sm:$0xff] }
 0x303   : > { %1208 = vrot.lane.b32.xlu1 %v2601_v31, %s2392_s24 }
 0x307   : > { %1284 = vrot.lane.b32.xlu1 %v2604_v33, %s2392_s24 }
 0x30c   : > { %1132 = vrot.lane.b32.xlu0 %v2598_v29, %s2392_s24  ;;  %s384_s24 = scalar_lea.vmem [#allocation4], %s1976_s0  ;;  %s2325_s0 = sshll.u32 %s2393_s29, 4  ;;  %s2326_s0 = int_to_ptr.vmem [resolvable:$false] %s2325_s0 }
 0x30d   : > { %s1913_s30 = sshll.u32 %s384_s24, 4  ;;  %s2327_s21 = scalar_lea.vmem %s2326_s0, 256  ;;  %s2779_s30 = int_to_ptr.vmem [resolvable:$true] %s1913_s30 }
 0x30e   : > { %s2321_s20 = scalar_lea.vmem %s2779_s30, 128  ;;  %p2328_p5 = scmp.lt.s32.totalorder %s2779_s30, %s2326_s0 }
 0x30f   : > { %p2322_p2 = scmp.ne.s32.totalorder %s2779_s30, %s2321_s20  ;;  %p2329_p6 = scmp.lt.s32.totalorder %s2327_s21, %s2321_s20 }
 0x311   : > { %p2323_p3 = pnand %p2322_p2, %p2500_p10  ;;  %p2330_p7 = por %p2329_p6, %p2328_p5 }
 0x313   : > { %p2324_p4 = pneg %p2323_p3 }
 0x315   : > { %p2331_p8 = pnand %p2330_p7, %p2324_p4 }
 0x377   : > { %v1038_v23 = vpop.xlane.xlu1 %1037 }
 0x378   : > { %2297 = vrcp.f32 %v1038_v23 }
 0x37b   : > { %v1041_v24 = vpop.xlane.xlu0 %1040 }
 0x37c   : > { %2299 = vrcp.f32 %v1041_v24 }
 0x37f   : > { %v1044_v25 = vpop.xlane.xlu1 %1043 }
 0x380   : > { %2301 = vrcp.f32 %v1044_v25 }
 0x382   : > { %v2298_v26 = vpop.eup %2297 }
 0x383   : > { %v1052_v27 = vmul.f32 %v2298_v26, %v2290_v13  ;;  %v1209_v28 = vpop.permute.xlu1 %1208  ;;  %v1047_v30 = vpop.xlane.xlu0 %1046 }
 0x384   : > { %2303 = vrcp.f32 %v1047_v30 }
 0x385   : > { %2135 = vmatmul.mubr.msk.f32.vlgmr.msra.gmra.mrb[10].mxu0 %vm694_vm2, %v1052_v27 }
 0x386   : > { %v2300_v31 = vpop.eup %2299  ;;  %2143 = vmatpush3.msra.mxu0 %v1209_v28  ;;  %2144 = vmatprep.mubr.msk.f32.mxu0 %vm2389_vm0, %v2390_v9  ;;  %v1998_v28 = vld [vmem:[%s2824_s4] ss:$0 sm:$0xff] }
 0x387   : > { %v1053_v32 = vmul.f32 %v2300_v31, %v2292_v16  ;;  %v1133_v29 = vpop.permute.xlu0 %1132  ;;  %2152 = vmatprep.subr.mxu0 %v2390_v9  ;;  %v1285_v33 = vpop.permute.xlu1 %1284  ;;  %v1781_v16 = vld [vmem:[%s2828_s8 + $0x10] sm:$0xff]  ;;  %v1999_v31 = vld [vmem:[%s2825_s5] ss:$0 sm:$0xff] }
 0x388   : > { %2138 = vmatpush3.msra.mxu1 %v1133_v29 }
 0x389   : > { %2140 = vmatmul.mubr.msk.f32.vlgmr.msra.gmra.mrb[6].mxu1 %vm694_vm2, %v1053_v32  ;;  %2147 = vmatprep.subr.mxu1 %v2390_v9 }
 0x38a   : > { %v2302_v34 = vpop.eup %2301  ;;  %2148 = vmatpush3.msra.mxu1 %v1285_v33  ;;  %2149 = vmatprep.mubr.msk.f32.mxu1 %vm2389_vm0, %v2390_v9  ;;  %v1786_v33 = vld [vmem:[%s2828_s8 + $0x38] sm:$0xff] }
 0x38b   : > { %v1054_v35 = vmul.f32 %v2302_v34, %v2294_v19  ;;  %2157 = vmatprep.subr.mxu1 %v2390_v9  ;;  %v1782_v19 = vld [vmem:[%s2828_s8 + $0x18] sm:$0xff] }
 0x38c   : > { %v2236_v20 = vpack.c.bf16 %v1782_v19, %v1781_v16 }
 0x38d   : > { %2145 = vmatmul.mubr.msk.f32.vlgmr.msra.gmra.mrb[12].mxu0 %vm694_vm2, %v1054_v35  ;;  %v2000_v35 = vld [vmem:[%s2827_s7] ss:$0 sm:$0xff] }
 0x38e   : > { %v2304_v36 = vpop.eup %2303  ;;  %2154 = vmatprep.mubr.msk.f32.mxu0 %vm2389_vm0, %v2390_v9  ;;  %2153 = vmatpush3.msra.mxu0 %v1360_v38 }
 0x38f   : > { %v1055_v37 = vmul.f32 %v2304_v36, %v2296_v21  ;;  %2162 = vmatprep.subr.mxu0 %v2390_v9  ;;  %v1783_v21 = vld [vmem:[%s2828_s8 + $0x20] sm:$0xff] }
 0x390   : > { %v2239_v23 = vpack.c.bf16 %v1784_v22, %v1783_v21 }
 0x391   : > { %2150 = vmatmul.mubr.msk.f32.vlgmr.msra.gmra.mrb[8].mxu1 %vm694_vm2, %v1055_v37 }
 0x392   : > { %2159 = vmatprep.mubr.msk.f32.mxu1 %vm2389_vm0, %v2390_v9  ;;  %2158 = vmatpush3.msra.mxu1 %v1361_v39 }
 0x393   : > { %2167 = vmatprep.subr.mxu1 %v2390_v9 }
 0x458   : > { %v1128_v41 = vpop.f32.mrb[10].mxu0 }
 0x459   : > { %v2136_v42 = vpop.f32.mrb[11].mxu0  ;;  %2155 = vmatmul.mubr.msk.f32.vlgmr.msra.gmra.mrb[14].mxu0 %vm694_vm2, %v1128_v41 }
 0x45a   : > { %2163 = vmatpush3.msra.mxu0 %v1362_v40  ;;  %2164 = vmatprep.mubr.msk.f32.mxu0 %vm2389_vm0, %v2390_v9  ;;  %v2002_v40 = vld [vmem:[%s2829_s9] ss:$0 sm:$0xff] }
 0x45b   : > { %2226 = vmatprep.subr.bf16.mxu0 %v2388_v3 }
 0x45c   : > { %v1204_v44 = vpop.f32.mrb[6].mxu1 }
 0x45d   : > { %v2141_v45 = vpop.f32.mrb[7].mxu1  ;;  %2160 = vmatmul.mubr.msk.f32.vlgmr.msra.gmra.mrb[10].mxu1 %vm694_vm2, %v1204_v44 }
 0x45e   : > { %2168 = vmatpush3.msra.mxu1 %v1363_v43  ;;  %2169 = vmatprep.mubr.msk.f32.mxu1 %vm2389_vm0, %v2390_v9 }
 0x45f   : > { %2232 = vmatprep.subr.bf16.mxu1 %v2388_v3 }
 0x460   : > { %v1280_v46 = vpop.f32.mrb[12].mxu0 }
 0x461   : > { %v2146_v47 = vpop.f32.mrb[13].mxu0  ;;  %2165 = vmatmul.mubr.msk.f32.vlgmr.msra.gmra.mrb[16].mxu0 %vm694_vm2, %v1280_v46 }
 0x462   : > { %2180 = vmatprep.mubr.msk.f32.mxu0 %vm2389_vm0, %v2390_v9  ;;  %2228 = vmatpush3.bf16.msra.mxu0 %v2227_v11 }
 0x463   : > { %2229 = vmatprep.subr.bf16.mxu0 %v2388_v3 }
 0x464   : > { %v1356_v48 = vpop.f32.mrb[8].mxu1 }
 0x465   : > { %v2151_v49 = vpop.f32.mrb[9].mxu1  ;;  %2170 = vmatmul.mubr.msk.f32.vlgmr.msra.gmra.mrb[12].mxu1 %vm694_vm2, %v1356_v48 }
 0x466   : > { %2199 = vmatprep.mubr.msk.f32.mxu1 %vm2389_vm0, %v2390_v9  ;;  %2234 = vmatpush3.bf16.msra.mxu1 %v2233_v17 }
 0x467   : > { %2235 = vmatprep.subr.bf16.mxu1 %v2388_v3 }
 0x46a   : > { %2237 = vmatpush3.bf16.msra.mxu1 %v2236_v20 }
 0x46b   : > { %2238 = vmatprep.subr.bf16.mxu1 %v2388_v3 }
 0x46e   : > { %2240 = vmatpush3.bf16.msra.mxu1 %v2239_v23 }
 0x46f   : > { %2241 = vmatprep.subr.bf16.mxu1 %v2388_v3  ;;  %v1785_v3 = vld [vmem:[%s2828_s8 + $0x30] sm:$0xff] }
 0x470   : > { %v2242_v34 = vpack.c.bf16 %v1786_v33, %v1785_v3 }
 0x472   : > { %2243 = vmatpush3.bf16.msra.mxu1 %v2242_v34 }
 0x52c   : > { %v1433_v50 = vpop.f32.mrb[14].mxu0 }
 0x52d   : > { %v2156_v51 = vpop.f32.mrb[15].mxu0  ;;  %v1656_v53 = vsel %vm407_vm1, %v1433_v50, 0.0 }
 0x530   : > { %v1506_v52 = vpop.f32.mrb[10].mxu1 }
 0x531   : > { %v1657_v54 = vsel %vm407_vm1, %v1506_v52, 0.0  ;;  %v2161_v55 = vpop.f32.mrb[11].mxu1 }
 0x532   : > { %v1658_v56 = vadd.f32 %v1657_v54, %v1656_v53  ;;  %v2004_v55 = vld [vmem:[%s2830_s10] ss:$0 sm:$0xff] }
 0x534   : > { %v1579_v57 = vpop.f32.mrb[16].mxu0 }
 0x535   : > { %v1659_v58 = vsel %vm407_vm1, %v1579_v57, 0.0  ;;  %v2166_v59 = vpop.f32.mrb[17].mxu0  ;;  %v2005_v57 = vld [vmem:[%s2831_s11] ss:$0 sm:$0xff] }
 0x536   : > { %v1660_v60 = vadd.f32 %v1659_v58, %v1658_v56 }
 0x538   : > { %v1652_v61 = vpop.f32.mrb[12].mxu1 }
 0x539   : > { %v1661_v62 = vsel %vm407_vm1, %v1652_v61, 0.0  ;;  %v2171_v63 = vpop.f32.mrb[13].mxu1 }
 0x53a   : > { %v1662_v0 = vadd.f32 %v1661_v62, %v1660_v60 }
 0x53c   : > { %v1663_v9 = vadd.f32 %v1662_v0, %v2559_v18  ;;  %v1696_v18 = vld [vmem:[%s2826_s6 + $0x10] sm:$0xff] }
 0x53d   : > { %v2230_v13 = vpack.c.bf16 %v1697_v12, %v1696_v18 }
 0x53e   : > { %v1664_v1 = vsel %vm407_vm1, %v1663_v9, 0.0 }
 0x53f   : > { %1665 = vadd.xlane.f32.xlu0 %v1664_v1  ;;  %2231 = vmatpush3.bf16.msra.mxu0 %v2230_v13 }
 0x5cc   : > { %v1666_v2 = vpop.xlane.xlu0 %1665 }
 0x5cd   : > { %v1668_v4 = vmul.f32 0.03125, %v1666_v2 }
 0x5cf   : > { %v1669_v5 = vsub.f32 %v1663_v9, %v1668_v4 }
 0x5d1   : > { %v1670_v6 = vmul.f32 %v1669_v5, %v1669_v5 }
 0x5d3   : > { %v1671_v7 = vsel %vm407_vm1, %v1670_v6, 0.0 }
 0x5d4   : > { %1672 = vadd.xlane.f32.xlu1 %v1671_v7 }
 0x661   : > { %v1673_v24 = vpop.xlane.xlu1 %1672 }
 0x662   : > { %v1674_v25 = vmul.f32 0.03125, %v1673_v24 }
 0x664   : > { %v1675_v26 = vadd.f32 1e-05, %v1674_v25 }
 0x666   : > { %2305 = vrsqrt.f32 %v1675_v26 }
 0x670   : > { %v2306_v27 = vpop.eup %2305 }
 0x671   : > { %v1677_v30 = vmul.f32 %v2306_v27, %v1669_v5 }
 0x673   : > { %v1685_v32 = vmul.f32 %v1998_v28, %v1677_v30 }
 0x675   : > { %v1693_v29 = vadd.f32 %v1999_v31, %v1685_v32 }
 0x677   : > { %2181 = vmatmul.mubr.msk.f32.vlgmr.msra.gmra.mrb[18].mxu0 %vm407_vm1, %v1693_v29 }
 0x74a   : > { %v1774_v36 = vpop.f32.mrb[18].mxu0 }
 0x74b   : > { %v1775_v37 = vadd.f32 %v2000_v35, %v1774_v36  ;;  %v2182_v38 = vpop.f32.mrb[19].mxu0 }
 0x74d   : > { %v1778_v39 = vmax.f32 %v1775_v37, 0.0 }
 0x74f   : > { %2200 = vmatmul.mubr.msk.f32.vlgmr.msra.gmra.mrb[14].mxu1 %vm1794_vm4, %v1778_v39 }
 0x822   : > { %v1864_v41 = vpop.f32.mrb[14].mxu1 }
 0x823   : > { %v1865_v42 = vadd.f32 %v2002_v40, %v1864_v41  ;;  %v2201_v43 = vpop.f32.mrb[15].mxu1 }
 0x825   : > { %v1868_v44 = vadd.f32 %v1865_v42, %v1693_v29 }
 0x827   : > { %v1869_v45 = vsel %vm407_vm1, %v1868_v44, 0.0 }
 0x828   : > { %1870 = vadd.xlane.f32.xlu0 %v1869_v45 }
 0x8b5   : > { %v1871_v46 = vpop.xlane.xlu0 %1870 }
 0x8b6   : > { %v1872_v47 = vmul.f32 0.03125, %v1871_v46 }
 0x8b8   : > { %v1873_v48 = vsub.f32 %v1868_v44, %v1872_v47 }
 0x8ba   : > { %v1874_v49 = vmul.f32 %v1873_v48, %v1873_v48 }
 0x8bc   : > { %v1875_v50 = vsel %vm407_vm1, %v1874_v49, 0.0 }
 0x8bd   : > { %1876 = vadd.xlane.f32.xlu0 %v1875_v50 }
 0x94a   : > { %v1877_v51 = vpop.xlane.xlu0 %1876 }
 0x94b   : > { %v1878_v52 = vmul.f32 0.03125, %v1877_v51 }
 0x94d   : > { %v1879_v53 = vadd.f32 1e-05, %v1878_v52 }
 0x94f   : > { %2307 = vrsqrt.f32 %v1879_v53 }
 0x959   : > { %v2308_v54 = vpop.eup %2307 }
 0x95a   : > { %v1881_v56 = vmul.f32 %v2308_v54, %v1873_v48 }
 0x95c   : > { %v1889_v58 = vmul.f32 %v2004_v55, %v1881_v56 }
 0x95e   : > { %v1897_v59 = vadd.f32 %v2005_v57, %v1889_v58 }
 0x960   : > { %1898 = vst.msk [vmem:[%s384_s24] sm:$0xff] %vm407_vm1, %v1897_v59 }
 0x961   : > { %2334 = shalt.err (!%p2331_p8)
}
 0x962   : > { %s2335_s19 = scalar_lea.hbm %s2777_s15, 128  ;;  %s2339_s24 = scalar_lea.hbm %s2832_s12, 256 }
 0x963   : > { %p2336_p9 = scmp.ne.s32.totalorder %s2777_s15, %s2335_s19  ;;  %p2340_p0 = scmp.lt.u32.totalorder %s2777_s15, %s2832_s12 }
 0x964   : > { %p2341_p1 = scmp.lt.u32.totalorder %s2339_s24, %s2335_s19  ;;  %p2343_p3 = scmp.lt.u32.totalorder %s2335_s19, %s2777_s15 }
 0x965   : > { %p2337_p12 = pnand %p2336_p9, %p2500_p10 }
 0x966   : > { %p2342_p2 = por %p2341_p1, %p2340_p0 }
 0x967   : > { %p2338_p13 = pneg %p2337_p12 }
 0x968   : > { %p2344_p4 = por %p2343_p3, %p2342_p2 }
 0x96a   : > { %p2345_p5 = pnand %p2344_p4, %p2338_p13 }
 0x96c   : > { %2348 = shalt.err (!%p2345_p5)
}
 0x96d   : > { %2244 = dma.vmem_to_hbm [thread:$0]  (%p2500_p10), %s2779_s30, 128, %s2777_s15, %s1900_s16  }
 0x96e PF: > { %p2250_p6 = scmp.ge.s32.totalorder %s2385_s28, 2  ;;  %s1925_s20 = sand.u32 1, %s2373_s26  }
 0x96f   : > { %s1926_s29 = scalar_lea.sflag [#allocation5], %s1925_s20 }
 0x970   : > { %p2247_p7 = pnand %p2250_p6, %p2504_p11 }
 0x972   : > { %2368 = dma.done.wait (!%p2247_p7), %s1926_s29, 128  }
 0x973   : > { %2370 = vsyncadd (!%p2247_p7), %s1926_s29, 4294967168  ;;  %s2840_s0 = sld [smem:[#allocation8_spill]]  ;;  %s2841_s21 = sld [smem:[#allocation9_spill]] }
 0x974   : > { %p28_p8 = scmp.ge.s32.totalorder %s2487_s13, 4   ;;  %s2842_s26 = smov %s2377_s27 }
 0x975   : > { %s2845_s28 = smov %s2487_s13 }
 0x976   :  { %30 = sbr.rel (!%p28_p8) target bundleno = 18 (0x12), region = 99 }
 0x979   : > { %s2843_s27 = smov %s2840_s0  ;;  %s2844_s0 = smov %s2841_s21 }
 0x97d   :  { %1931 = vsyncpa [#allocation5], 1 }
 0x97e   :  { %1933 = vsyncpa [#allocation5 + $0x1], 1 }

</bundles_post_ra>
